<compile_context>
chip_gen: v5e
topology: v5e:2x2
jax: 0.10.0
libtpu: 0.0.40
codegen_flags: <defaults>
</compile_context>

<pallas_src>
import jax
import jax.numpy as jnp
from jax import lax
from jax.experimental import pallas as pl
from jax.experimental.pallas import tpu as pltpu


def _round_up(n, m):
    return ((n + m - 1) // m) * m


def _choose_tb(batch, tb_max=2048):
    # Tiles are multiples of 128 lanes; keep >= 2 grid steps for large batches
    # so the "parallel" axis can shard across v7x's two TensorCores.
    tb = _round_up(pl.cdiv(batch, 2), 128)
    return max(128, min(tb_max, tb))


def mlp_kernel(x_ref, w1_ref, b1_ref, w2_ref, b2_ref, w3_ref, b3_ref,
               probs_ref, logits_ref):
    # x_ref: (TB, num_bits) f32 tile of the batch; cast to bf16 in-VMEM (VPU).
    x_bf = x_ref[...].astype(jnp.bfloat16)

    # layer1 + ReLU (dropout = identity in eval), computed transposed:
    #   h1t[u, b] = sum_k w1t[u, k] * x[b, k]   -> (units, TB), lane-dense.
    h1 = lax.dot_general(
        w1_ref[...], x_bf,
        dimension_numbers=(((1,), (1,)), ((), ())),
        preferred_element_type=jnp.float32) + b1_ref[...]
    h1 = jnp.maximum(h1, 0.0)

    # layer2 + ReLU (dropout = identity in eval): standard (U,U)@(U,TB) matmul.
    h2 = jnp.dot(w2_ref[...], h1.astype(jnp.bfloat16),
                 preferred_element_type=jnp.float32) + b2_ref[...]
    h2 = jnp.maximum(h2, 0.0)

    # layer3 -> logits.T: (4, U) @ (U, TB) = (4, TB)
    logits_t = jnp.dot(w3_ref[...], h2.astype(jnp.bfloat16),
                       preferred_element_type=jnp.float32) + b3_ref[...]

    # softmax over the 4 classes (sublane axis here); matches F.softmax(dim=1)
    # on the untransposed (B, 4) logits.
    m = jnp.max(logits_t, axis=0, keepdims=True)
    e = jnp.exp(logits_t - m)
    inv = pl.reciprocal(jnp.sum(e, axis=0, keepdims=True), approx=False)
    probs_t = e * inv

    probs_ref[...] = probs_t.astype(probs_ref.dtype)
    logits_ref[...] = logits_t.astype(logits_ref.dtype)


def prepare_params(w1, b1, w2, b2, w3, b3):
    """One-time parameter prep (outside the hot path): transpose weights to
    (out_features, in_features) and cast to bf16; biases to (out_features, 1) f32."""
    tw = lambda w: jnp.asarray(w).T.astype(jnp.bfloat16)
    tb = lambda b: jnp.asarray(b).reshape(-1, 1).astype(jnp.float32)
    return tw(w1), tb(b1), tw(w2), tb(b2), tw(w3), tb(b3)


def mlp_forward(x, w1t, b1t, w2t, b2t, w3t, b3t, *, tb_max=2048):
    B, num_bits = x.shape
    n_out = w3t.shape[0]

    TB = _choose_tb(B, tb_max)
    grid = (pl.cdiv(B, TB),)

    const = lambda shape: pl.BlockSpec(shape, lambda i: (0, 0))
    out_spec = pl.BlockSpec((n_out, TB), lambda i: (0, i))

    probs_t, logits_t = pl.pallas_call(
        mlp_kernel,
        grid=grid,
        in_specs=[
            pl.BlockSpec((TB, num_bits), lambda i: (i, 0)),   # x: tiled over batch
            const(w1t.shape), const(b1t.shape),               # params: VMEM-resident
            const(w2t.shape), const(b2t.shape),
            const(w3t.shape), const(b3t.shape),
        ],
        out_specs=(out_spec, out_spec),
        out_shape=(
            jax.ShapeDtypeStruct((n_out, B), jnp.float32),    # probs.T
            jax.ShapeDtypeStruct((n_out, B), jnp.float32),    # logits.T
        ),
        compiler_params=pltpu.CompilerParams(
            dimension_semantics=("parallel",)),
    )(x, w1t, b1t, w2t, b2t, w3t, b3t)

    # Tiny (4, B) -> (B, 4) transposes; everything upstream stayed lane-dense.
    return probs_t.T, logits_t.T


def init_params(key, num_bits, num_units):
    # Deterministic init mimicking nn.Linear default (uniform +/- 1/sqrt(fan_in)).
    ks = jax.random.split(key, 6)

    def linear(kw, kb, fan_in, fan_out):
        bound = 1.0 / jnp.sqrt(fan_in)
        w = jax.random.uniform(kw, (fan_in, fan_out), jnp.float32, -bound, bound)
        b = jax.random.uniform(kb, (1, fan_out), jnp.float32, -bound, bound)
        return w, b

    w1, b1 = linear(ks[0], ks[1], num_bits, num_units)
    w2, b2 = linear(ks[2], ks[3], num_units, num_units)
    w3, b3 = linear(ks[4], ks[5], num_units, 4)
    return w1, b1, w2, b2, w3, b3


def reference(x, params):
    # Plain-JAX reference matching the kernel's bf16-input / f32-accumulate math.
    w1, b1, w2, b2, w3, b3 = params
    bf = lambda a: a.astype(jnp.bfloat16).astype(jnp.float32)
    h1 = jnp.maximum(bf(x) @ bf(w1) + b1, 0.0)
    h2 = jnp.maximum(bf(h1) @ bf(w2) + b2, 0.0)
    logits = bf(h2) @ bf(w3) + b3
    return jax.nn.softmax(logits, axis=-1), logits


if __name__ == "__main__":
    key = jax.random.PRNGKey(0)
    k_x, k_p, k_x2 = jax.random.split(key, 3)

    num_bits, num_units = 32, 32
    raw_params = init_params(k_p, num_bits, num_units)
    params = prepare_params(*raw_params)      # one-time transpose + bf16 cast

    fwd = jax.jit(mlp_forward)

    # --- small test (batch=8, single grid step, masked ragged tile) ---
    x_small = jax.random.normal(k_x, (8, num_bits), jnp.float32)
    probs, logits = fwd(x_small, *params)
    jax.block_until_ready((probs, logits))

    ref_probs, ref_logits = reference(x_small, raw_params)
    assert probs.shape == (8, 4) and logits.shape == (8, 4)
    assert jnp.allclose(logits, ref_logits, atol=2e-4, rtol=2e-4)
    assert jnp.allclose(probs, ref_probs, atol=1e-3)
    assert jnp.allclose(jnp.sum(probs, axis=-1), 1.0, atol=1e-3)

    # --- larger test (batch=600 -> TB=384, two grid steps, ragged last tile) ---
    x_big = jax.random.normal(k_x2, (600, num_bits), jnp.float32)
    probs_b, logits_b = fwd(x_big, *params)
    jax.block_until_ready((probs_b, logits_b))

    ref_probs_b, ref_logits_b = reference(x_big, raw_params)
    assert probs_b.shape == (600, 4) and logits_b.shape == (600, 4)
    assert jnp.allclose(logits_b, ref_logits_b, atol=2e-4, rtol=2e-4)
    assert jnp.allclose(probs_b, ref_probs_b, atol=1e-3)
    assert jnp.allclose(jnp.sum(probs_b, axis=-1), 1.0, atol=1e-3)

    print("KERNEL_OK")
</pallas_src>

<mosaic_0001>
module attributes {stable_mosaic.version = 11 : i64} {
  func.func @mlp_kernel(%arg0: i32, %arg1: memref<128x32xf32, #tpu.memory_space<vmem>>, %arg2: memref<32x32xbf16, #tpu.memory_space<vmem>>, %arg3: memref<32x1xf32, #tpu.memory_space<vmem>>, %arg4: memref<32x32xbf16, #tpu.memory_space<vmem>>, %arg5: memref<32x1xf32, #tpu.memory_space<vmem>>, %arg6: memref<4x32xbf16, #tpu.memory_space<vmem>>, %arg7: memref<4x1xf32, #tpu.memory_space<vmem>>, %arg8: memref<4x128xf32, #tpu.memory_space<vmem>>, %arg9: memref<4x128xf32, #tpu.memory_space<vmem>>) attributes {dimension_semantics = [#tpu.dimension_semantics<parallel>], iteration_bounds = array<i64: 1>, scalar_prefetch = 0 : i64, scratch_operands = 0 : i64, tpu.core_type = #tpu.core_type<tc>, window_params = [{transform_indices = @transform_0, window_bounds = array<i64: 128, 32>}, {pipeline_mode = #tpu.pipeline_mode<synchronous>, transform_indices = @transform_1, window_bounds = array<i64: 32, 32>}, {pipeline_mode = #tpu.pipeline_mode<synchronous>, transform_indices = @transform_2, window_bounds = array<i64: 32, 1>}, {pipeline_mode = #tpu.pipeline_mode<synchronous>, transform_indices = @transform_3, window_bounds = array<i64: 32, 32>}, {pipeline_mode = #tpu.pipeline_mode<synchronous>, transform_indices = @transform_4, window_bounds = array<i64: 32, 1>}, {pipeline_mode = #tpu.pipeline_mode<synchronous>, transform_indices = @transform_5, window_bounds = array<i64: 4, 32>}, {pipeline_mode = #tpu.pipeline_mode<synchronous>, transform_indices = @transform_6, window_bounds = array<i64: 4, 1>}, {transform_indices = @transform_7, window_bounds = array<i64: 4, 128>}, {transform_indices = @transform_8, window_bounds = array<i64: 4, 128>}]} {
    %c0 = arith.constant 0 : index
    %c0_0 = arith.constant 0 : index
    %0 = vector.load %arg1[%c0, %c0_0] : memref<128x32xf32, #tpu.memory_space<vmem>>, vector<128x32xf32>
    %1 = arith.truncf %0 : vector<128x32xf32> to vector<128x32xbf16>
    %c0_1 = arith.constant 0 : index
    %c0_2 = arith.constant 0 : index
    %2 = vector.load %arg2[%c0_1, %c0_2] : memref<32x32xbf16, #tpu.memory_space<vmem>>, vector<32x32xbf16>
    %cst = arith.constant dense<0.000000e+00> : vector<32x128xf32>
    %3 = tpu.matmul %2, %1, %cst {dimension_numbers = #tpu.dot_dimension_numbers<[1], [1], [0], [0], [0, 0, 1, 0], [], []>} : vector<32x32xbf16>, vector<128x32xbf16>, vector<32x128xf32> -> vector<32x128xf32>
    %c0_3 = arith.constant 0 : index
    %c0_4 = arith.constant 0 : index
    %4 = vector.load %arg3[%c0_3, %c0_4] : memref<32x1xf32, #tpu.memory_space<vmem>>, vector<32x1xf32>
    %5 = vector.broadcast %4 : vector<32x1xf32> to vector<32x128xf32>
    %6 = arith.addf %3, %5 : vector<32x128xf32>
    %cst_5 = arith.constant 0.000000e+00 : f32
    %7 = vector.broadcast %cst_5 : f32 to vector<32x128xf32>
    %8 = arith.maximumf %6, %7 : vector<32x128xf32>
    %c0_6 = arith.constant 0 : index
    %c0_7 = arith.constant 0 : index
    %9 = vector.load %arg4[%c0_6, %c0_7] : memref<32x32xbf16, #tpu.memory_space<vmem>>, vector<32x32xbf16>
    %10 = arith.truncf %8 : vector<32x128xf32> to vector<32x128xbf16>
    %cst_8 = arith.constant dense<0.000000e+00> : vector<32x128xf32>
    %11 = tpu.matmul %9, %10, %cst_8 {dimension_numbers = #tpu.dot_dimension_numbers<[1], [0], [0], [1], [0, 0, 1, 1], [], []>} : vector<32x32xbf16>, vector<32x128xbf16>, vector<32x128xf32> -> vector<32x128xf32>
    %c0_9 = arith.constant 0 : index
    %c0_10 = arith.constant 0 : index
    %12 = vector.load %arg5[%c0_9, %c0_10] : memref<32x1xf32, #tpu.memory_space<vmem>>, vector<32x1xf32>
    %13 = vector.broadcast %12 : vector<32x1xf32> to vector<32x128xf32>
    %14 = arith.addf %11, %13 : vector<32x128xf32>
    %cst_11 = arith.constant 0.000000e+00 : f32
    %15 = vector.broadcast %cst_11 : f32 to vector<32x128xf32>
    %16 = arith.maximumf %14, %15 : vector<32x128xf32>
    %c0_12 = arith.constant 0 : index
    %c0_13 = arith.constant 0 : index
    %17 = vector.load %arg6[%c0_12, %c0_13] : memref<4x32xbf16, #tpu.memory_space<vmem>>, vector<4x32xbf16>
    %18 = arith.truncf %16 : vector<32x128xf32> to vector<32x128xbf16>
    %cst_14 = arith.constant dense<0.000000e+00> : vector<4x128xf32>
    %19 = tpu.matmul %17, %18, %cst_14 {dimension_numbers = #tpu.dot_dimension_numbers<[1], [0], [0], [1], [0, 0, 1, 1], [], []>} : vector<4x32xbf16>, vector<32x128xbf16>, vector<4x128xf32> -> vector<4x128xf32>
    %c0_15 = arith.constant 0 : index
    %c0_16 = arith.constant 0 : index
    %20 = vector.load %arg7[%c0_15, %c0_16] : memref<4x1xf32, #tpu.memory_space<vmem>>, vector<4x1xf32>
    %21 = vector.broadcast %20 : vector<4x1xf32> to vector<4x128xf32>
    %22 = arith.addf %19, %21 : vector<4x128xf32>
    %cst_17 = arith.constant dense<0xFF800000> : vector<128xf32>
    %23 = vector.multi_reduction <maximumf>, %22, %cst_17 [0] : vector<4x128xf32> to vector<128xf32>
    %24 = vector.shape_cast %23 : vector<128xf32> to vector<1x128xf32>
    %25 = vector.broadcast %24 : vector<1x128xf32> to vector<4x128xf32>
    %26 = arith.subf %22, %25 : vector<4x128xf32>
    %27 = math.exp %26 : vector<4x128xf32>
    %cst_18 = arith.constant dense<0.000000e+00> : vector<128xf32>
    %28 = vector.multi_reduction <add>, %27, %cst_18 [0] : vector<4x128xf32> to vector<128xf32>
    %29 = vector.shape_cast %28 : vector<128xf32> to vector<1x128xf32>
    %30 = tpu.reciprocal %29 : vector<1x128xf32> -> vector<1x128xf32>
    %31 = vector.broadcast %30 : vector<1x128xf32> to vector<4x128xf32>
    %32 = arith.mulf %27, %31 : vector<4x128xf32>
    %c0_19 = arith.constant 0 : index
    %c0_20 = arith.constant 0 : index
    %33 = vector.load %arg8[%c0_19, %c0_20] : memref<4x128xf32, #tpu.memory_space<vmem>>, vector<4x128xf32>
    tpu.vector_store %arg8[%c0_19, %c0_20], %32 {strides = array<i32>} : memref<4x128xf32, #tpu.memory_space<vmem>>, vector<4x128xf32>,
    %c0_21 = arith.constant 0 : index
    %c0_22 = arith.constant 0 : index
    %34 = vector.load %arg9[%c0_21, %c0_22] : memref<4x128xf32, #tpu.memory_space<vmem>>, vector<4x128xf32>
    tpu.vector_store %arg9[%c0_21, %c0_22], %22 {strides = array<i32>} : memref<4x128xf32, #tpu.memory_space<vmem>>, vector<4x128xf32>,
    return
  }
  func.func @transform_0(%arg0: i32) -> (i32, i32) {
    %c0_i32 = arith.constant 0 : i32
    %c0_i32_0 = arith.constant 0 : i32
    return %arg0, %c0_i32 : i32, i32
  }
  func.func @transform_1(%arg0: i32) -> (i32, i32) {
    %c0_i32 = arith.constant 0 : i32
    %c0_i32_0 = arith.constant 0 : i32
    %c0_i32_1 = arith.constant 0 : i32
    return %c0_i32, %c0_i32_0 : i32, i32
  }
  func.func @transform_2(%arg0: i32) -> (i32, i32) {
    %c0_i32 = arith.constant 0 : i32
    %c0_i32_0 = arith.constant 0 : i32
    %c0_i32_1 = arith.constant 0 : i32
    return %c0_i32, %c0_i32_0 : i32, i32
  }
  func.func @transform_3(%arg0: i32) -> (i32, i32) {
    %c0_i32 = arith.constant 0 : i32
    %c0_i32_0 = arith.constant 0 : i32
    %c0_i32_1 = arith.constant 0 : i32
    return %c0_i32, %c0_i32_0 : i32, i32
  }
  func.func @transform_4(%arg0: i32) -> (i32, i32) {
    %c0_i32 = arith.constant 0 : i32
    %c0_i32_0 = arith.constant 0 : i32
    %c0_i32_1 = arith.constant 0 : i32
    return %c0_i32, %c0_i32_0 : i32, i32
  }
  func.func @transform_5(%arg0: i32) -> (i32, i32) {
    %c0_i32 = arith.constant 0 : i32
    %c0_i32_0 = arith.constant 0 : i32
    %c0_i32_1 = arith.constant 0 : i32
    return %c0_i32, %c0_i32_0 : i32, i32
  }
  func.func @transform_6(%arg0: i32) -> (i32, i32) {
    %c0_i32 = arith.constant 0 : i32
    %c0_i32_0 = arith.constant 0 : i32
    %c0_i32_1 = arith.constant 0 : i32
    return %c0_i32, %c0_i32_0 : i32, i32
  }
  func.func @transform_7(%arg0: i32) -> (i32, i32) {
    %c0_i32 = arith.constant 0 : i32
    %c0_i32_0 = arith.constant 0 : i32
    return %c0_i32, %arg0 : i32, i32
  }
  func.func @transform_8(%arg0: i32) -> (i32, i32) {
    %c0_i32 = arith.constant 0 : i32
    %c0_i32_0 = arith.constant 0 : i32
    return %c0_i32, %arg0 : i32, i32
  }
}

</mosaic_0001>

<bundles_post_ra>
// kernel: mlp_forward.1
= control target key start
LH: loop header
LB: loop body
LE: loop exit
PB: predicated region body
PF: predicated region fallthrough
CT: control target
= control target key end

     0   :  { %14 = vsyncpa [#allocation3], 0  ;;  %vm93_vm0 = vcmask 261120   ;;  %s562_s0 = inlined_call_operand.vmem [shape: f32[8,32], index: 0, kind: input, shape index: {}]   ;;  %s563_s1 = inlined_call_operand.vmem [shape: bf16[32,32], index: 1, kind: input, shape index: {}]   ;;  %s564_s2 = inlined_call_operand.vmem [shape: f32[32,1], index: 2, kind: input, shape index: {}]   ;;  %s565_s3 = inlined_call_operand.vmem [shape: bf16[32,32], index: 3, kind: input, shape index: {}]   ;;  %s566_s4 = inlined_call_operand.vmem [shape: f32[32,1], index: 4, kind: input, shape index: {}]   ;;  %s567_s5 = inlined_call_operand.vmem [shape: bf16[4,32], index: 5, kind: input, shape index: {}]   ;;  %s568_s6 = inlined_call_operand.vmem [shape: f32[4,1], index: 6, kind: input, shape index: {}]   ;;  %s569_s7 = inlined_call_operand.hbm [shape: f32[4,8], index: 7, kind: output, shape index: {0}]   ;;  %s570_s8 = inlined_call_operand.hbm [shape: f32[4,8], index: 8, kind: output, shape index: {1}]  }
   0x1   :  { %v45_v0 = vld [vmem:[%s562_s0 + $0x70] sm:$0xff]  ;;  %v46_v1 = vld [vmem:[%s562_s0 + $0x78] sm:$0xff]  ;;  %v43_v3 = vld [vmem:[%s562_s0 + $0x60] sm:$0xff] }
   0x2   :  { %v54_v2 = vpack.c.bf16 %v46_v1, %v45_v0  ;;  %v44_v4 = vld [vmem:[%s562_s0 + $0x68] sm:$0xff] }
   0x4   :  { %v122_v5 = vsel %vm93_vm0, %v54_v2, 0 }
   0x5   :  { %15 = vsyncpa [#allocation5], 0  ;;  %333 = vmatpush.bf16.xpose.msra.mxu3 %v122_v5  ;;  %124 = vmatpush.bf16.xpose.msra.mxu0 %v122_v5  ;;  %v53_v6 = vpack.c.bf16 %v44_v4, %v43_v3  ;;  %v41_v8 = vld [vmem:[%s562_s0 + $0x50] sm:$0xff]  ;;  %v42_v9 = vld [vmem:[%s562_s0 + $0x58] sm:$0xff]  ;;  %v403_v19 = vmov 0   ;;  %s404_s15 = smov [#allocation4]  }
   0x6   :  { %v52_v10 = vpack.c.bf16 %v42_v9, %v41_v8  ;;  %v39_v12 = vld [vmem:[%s562_s0 + $0x40] sm:$0xff]  ;;  %v40_v13 = vld [vmem:[%s562_s0 + $0x48] sm:$0xff]  ;;  %v37_v16 = vld [vmem:[%s562_s0 + $0x30] sm:$0xff]  ;;  %344 = vset.pattern.permute.xlu0 %v403_v19  ;;  %345 = vset.pattern.permute.xlu1 %v403_v19  ;;  %s292_s16 = sshll.u32 %s404_s15, 4  ;;  %s294_s19 = sshll.u32 %s570_s8, 4  ;;  %vm241_vm1 = vcmask 1043456   ;;  %s293_s16 = int_to_ptr.vmem [resolvable:$true] %s292_s16  ;;  %s295_s19 = int_to_ptr.hbm [resolvable:$true] %s294_s19 }
   0x7   :  { %v119_v7 = vsel %vm93_vm0, %v53_v6, 0  ;;  %v51_v14 = vpack.c.bf16 %v40_v13, %v39_v12  ;;  %v38_v17 = vld [vmem:[%s562_s0 + $0x38] sm:$0xff]  ;;  %346 = vset.pattern.permute.xlu2 %v403_v19  ;;  %v35_v21 = vld [vmem:[%s562_s0 + $0x20] sm:$0xff]  ;;  %v36_v22 = vld [vmem:[%s562_s0 + $0x28] sm:$0xff]  ;;  %s283_s22 = sshll.u32 %s569_s7, 4  ;;  %s284_s22 = int_to_ptr.hbm [resolvable:$true] %s283_s22 }
   0x8   :  { %v116_v11 = vsel %vm93_vm0, %v52_v10, 0  ;;  %v50_v18 = vpack.c.bf16 %v38_v17, %v37_v16  ;;  %v61_v23 = vld [vmem:[%s564_s2 + $0x10] sm:$0xff]  ;;  %v59_v24 = vld [vmem:[%s564_s2] sm:$0xff]  ;;  %v49_v25 = vpack.c.bf16 %v36_v22, %v35_v21  ;;  %v34_v28 = vld [vmem:[%s562_s0 + $0x18] sm:$0xff] }
   0x9   :  { %v113_v15 = vsel %vm93_vm0, %v51_v14, 0  ;;  %75 = vperm.xlu0 %344, %v61_v23   ;;  %65 = vperm.xlu1 %345, %v59_v24   ;;  %v33_v27 = vld [vmem:[%s562_s0 + $0x10] sm:$0xff]  ;;  %v62_v29 = vld [vmem:[%s564_s2 + $0x18] sm:$0xff]  ;;  %v60_v30 = vld [vmem:[%s564_s2 + $0x8] sm:$0xff] }
   0xa   :  { %v110_v20 = vsel %vm93_vm0, %v50_v18, 0  ;;  %v107_v26 = vsel %vm93_vm0, %v49_v25, 0  ;;  %v48_v31 = vpack.c.bf16 %v34_v28, %v33_v27  ;;  %v31_v33 = vld [vmem:[%s562_s0] sm:$0xff]  ;;  %v32_v34 = vld [vmem:[%s562_s0 + $0x8] sm:$0xff]  ;;  %v155_v46 = vld [vmem:[%s566_s4 + $0x10] sm:$0xff] }
   0xb   :  { %v153_v35 = vld [vmem:[%s566_s4] sm:$0xff]  ;;  %v154_v36 = vld [vmem:[%s566_s4 + $0x8] sm:$0xff]  ;;  %v47_v37 = vpack.c.bf16 %v32_v34, %v31_v33  ;;  %169 = vperm.xlu2 %346, %v155_v46   ;;  %v156_v56 = vld [vmem:[%s566_s4 + $0x18] sm:$0xff] }
   0xc   :  { %v104_v32 = vsel %vm93_vm0, %v48_v31, 0  ;;  %v330_v39 = vld [vmem:[%s563_s1 + $0x8] sm:$0xff]  ;;  %v329_v40 = vld [vmem:[%s563_s1] sm:$0xff] }
   0xd   :  { %334 = vmatpush.bf16.xpose.msra.mxu3 %v119_v7  ;;  %125 = vmatpush.bf16.xpose.msra.mxu0 %v119_v7  ;;  %v101_v38 = vsel %vm93_vm0, %v47_v37, 0  ;;  %v331_v61 = vld [vmem:[%s565_s3] sm:$0xff]  ;;  %v332_v63 = vld [vmem:[%s565_s3 + $0x8] sm:$0xff] }
   0xe   :  { %v219_v62 = vld [vmem:[%s568_s6] sm:$0xf] }
   0xf   :  { %v216_v18 = vld [vmem:[%s567_s5] sm:$0x3]  ;;  %s405_s5 = smov [#allocation2]  }
  0x10   :  { %s281_s8 = sshll.u32 %s405_s5, 4  ;;  %s282_s8 = int_to_ptr.vmem [resolvable:$true] %s281_s8 }
  0x11   :  { %80 = vperm.xlu0 %344, %v62_v29   ;;  %70 = vperm.xlu1 %345, %v60_v30  }
  0x13   :  { %174 = vperm.xlu2 %346, %v156_v56  }
  0x15   :  { %335 = vmatpush.bf16.xpose.msra.mxu3 %v116_v11  ;;  %126 = vmatpush.bf16.xpose.msra.mxu0 %v116_v11 }
  0x19   :  { %159 = vperm.xlu0 %344, %v153_v35   ;;  %164 = vperm.xlu1 %345, %v154_v36  }
  0x1b   :  { %222 = vperm.xlu2 %346, %v219_v62  }
  0x1d   :  { %336 = vmatpush.bf16.xpose.msra.mxu3 %v113_v15  ;;  %127 = vmatpush.bf16.xpose.msra.mxu0 %v113_v15 }
  0x25   :  { %337 = vmatpush.bf16.xpose.msra.mxu3 %v110_v20  ;;  %128 = vmatpush.bf16.xpose.msra.mxu0 %v110_v20 }
  0x2d   :  { %338 = vmatpush.bf16.xpose.msra.mxu3 %v107_v26  ;;  %129 = vmatpush.bf16.xpose.msra.mxu0 %v107_v26 }
  0x35   :  { %339 = vmatpush.bf16.xpose.msra.mxu3 %v104_v32  ;;  %130 = vmatpush.bf16.xpose.msra.mxu0 %v104_v32 }
  0x3d   :  { %340 = vmatpush.bf16.xpose.msra.mxu3 %v101_v38  ;;  %131 = vmatpush.bf16.xpose.msra.mxu0 %v101_v38 }
  0x44   :  { %317 = vmatmul.msk.bf16.vlgmr.msra.gmra.mxu3 %vm93_vm0, %v330_v39  ;;  %316 = vmatmul.msk.bf16.vlgmr.msra.gmra.mxu0 %vm93_vm0, %v329_v40 }
  0x65   :  { %v170_v2 = vpop.permute.xlu2 %169 }
  0x6d   :  { %v175_v6 = vpop.permute.xlu2 %174 }
  0x75   :  { %v223_v19 = vpop.permute.xlu2 %222 }
  0x7b   :  { %v76_v42 = vpop.permute.xlu0 %75  ;;  %v66_v43 = vpop.permute.xlu1 %65 }
  0x83   :  { %v81_v47 = vpop.permute.xlu0 %80  ;;  %v71_v49 = vpop.permute.xlu1 %70 }
  0x8b   :  { %v165_v4 = vpop.permute.xlu1 %164  ;;  %v160_v10 = vpop.permute.xlu0 %159 }
  0xc1   :  { %v133_v41 = vpop.f32.mrf.mxu0 }
  0xc2   :  { %v134_v51 = vadd.f32 %v133_v41, %v66_v43 }
  0xc4   :  { %v143_v57 = vmax.f32 %v134_v51, 0.0 }
  0xc7   :  { %v138_v44 = vpop.f32.mrf.mxu3 }
  0xc8   :  { %v139_v48 = vadd.f32 %v138_v44, %v76_v42 }
  0xc9   :  { %v135_v45 = vpop.f32.mrf.mxu0 }
  0xca   :  { %v136_v52 = vadd.f32 %v135_v45, %v71_v49  ;;  %v145_v54 = vmax.f32 %v139_v48, 0.0 }
  0xcc   :  { %v144_v58 = vmax.f32 %v136_v52, 0.0 }
  0xce   :  { %v151_v60 = vpack.c.bf16 %v144_v58, %v143_v57 }
  0xcf   :  { %v140_v50 = vpop.f32.mrf.mxu3 }
  0xd0   :  { %v141_v53 = vadd.f32 %v140_v50, %v81_v47 }
  0xd2   :  { %v146_v55 = vmax.f32 %v141_v53, 0.0 }
  0xd4   :  { %v152_v59 = vpack.c.bf16 %v146_v55, %v145_v54 }
  0xd6   :  { %199 = vmatpush.bf16.msra.mxu1 %v152_v59 }
  0xda   :  { %200 = vmatpush.bf16.msra.mxu1 %v151_v60 }
  0xdd   :  { %326 = vmatmul.msk.bf16.vlgmr.msra.gmra.mxu1 %vm93_vm0, %v331_v61 }
  0xed   :  { %327 = vmatmul.msk.bf16.gmra.mxu1 %vm93_vm0, %v332_v63 }
 0x15a   :  { %v202_v0 = vpop.f32.mrf.mxu1 }
 0x15b   :  { %v203_v11 = vadd.f32 %v202_v0, %v160_v10 }
 0x15d   :  { %v212_v16 = vmax.f32 %v203_v11, 0.0 }
 0x162   :  { %v204_v1 = vpop.f32.mrf.mxu1 }
 0x163   :  { %v205_v8 = vadd.f32 %v204_v1, %v165_v4 }
 0x165   :  { %v213_v14 = vmax.f32 %v205_v8, 0.0 }
 0x167   :  { %v217_v17 = vpack.c.bf16 %v213_v14, %v212_v16 }
 0x16a   :  { %v207_v3 = vpop.f32.mrf.mxu1 }
 0x16b   :  { %v208_v5 = vadd.f32 %v207_v3, %v170_v2 }
 0x16d   :  { %v214_v12 = vmax.f32 %v208_v5, 0.0 }
 0x172   :  { %v209_v7 = vpop.f32.mrf.mxu1 }
 0x173   :  { %v210_v9 = vadd.f32 %v209_v7, %v175_v6 }
 0x175   :  { %v215_v13 = vmax.f32 %v210_v9, 0.0 }
 0x177   :  { %v218_v15 = vpack.c.bf16 %v215_v13, %v214_v12 }
 0x179   :  { %234 = vmatpush.bf16.msra.mxu2 %v218_v15 }
 0x17d   :  { %235 = vmatpush.bf16.msra.mxu2 %v217_v17 }
 0x180   :  { %328 = vmatmul.msk.bf16.vlgmr.msra.gmra.mxu2 %vm93_vm0, %v216_v18 }
 0x203   :  { %v237_v20 = vpop.f32.mrf.mxu2 }
 0x204   :  { %v238_v21 = vadd.f32 %v237_v20, %v223_v19 }
 0x206   :  { %v242_v22 = vsel %vm241_vm1, %v238_v21, -inf  ;;  %275 = vst [vmem:[#allocation4] sm:$0xf] %v238_v21 }
 0x207   :  { %v243_v23 = vrot.slane %v242_v22, 4  ;;  %297 = dma.vmem_to_hbm [thread:$0]  %s293_s16, 64, %s295_s19, [#allocation5]  }
 0x209   :  { %v244_v24 = vmax.f32 %v242_v22, %v243_v23 }
 0x20b   :  { %v245_v25 = vrot.slane %v244_v24, 2  ;;  %v239_v26 = vpop.f32.mrf.mxu2 }
 0x20d   :  { %v246_v27 = vmax.f32 %v244_v24, %v245_v25 }
 0x20f   :  { %v247_v28 = vrot.slane %v246_v27, 1 }
 0x211   :  { %v248_v29 = vmax.f32 %v246_v27, %v247_v28 }
 0x213   :  { %v249_v30 = vsub.f32 %v238_v21, %v248_v29 }
 0x215   :  { %v250_v31 = vmul.f32 1.442695, %v249_v30 }
 0x217   :  { %347 = vpow2.f32 %v250_v31 }
 0x21d   :  { %v348_v32 = vpop.eup %347 }
 0x21e   :  { %v252_v33 = vsel %vm241_vm1, %v348_v32, 0.0 }
 0x21f   :  { %v253_v34 = vrot.slane %v252_v33, 4 }
 0x221   :  { %v254_v35 = vadd.f32 %v253_v34, %v252_v33 }
 0x223   :  { %v255_v36 = vrot.slane %v254_v35, 2 }
 0x225   :  { %v256_v37 = vadd.f32 %v255_v36, %v254_v35 }
 0x227   :  { %v257_v38 = vrot.slane %v256_v37, 1 }
 0x229   :  { %v258_v39 = vadd.f32 %v257_v38, %v256_v37 }
 0x22b   :  { %349 = vrcp.f32 %v258_v39  ;;  %v270_v43 = vand.u32 2147483648, %v258_v39  ;;  %v268_v45 = vand.u32 2147483647, %v258_v39  ;;  %vm264_vm3 = vweird.f32 %v258_v39 }
 0x22d   :  { %v271_v47 = vor.u32 1.1754944e-38, %v270_v43  ;;  %vm269_vm5 = vcmp.eq.f32.partialorder %v268_v45, 8.507059e+37 }
 0x231   :  { %v350_v40 = vpop.eup %349 }
 0x232   :  { %v260_v41 = vmul.f32 %v350_v40, %v258_v39  ;;  %vm265_vm2 = vweird.f32 %v350_v40 }
 0x233   :  { %vm266_vm4 = vmor %vm264_vm3, %vm265_vm2 }
 0x234   :  { %v261_v42 = vsub.f32 1.0, %v260_v41 }
 0x236   :  { %v262_v44 = vmul.f32 %v350_v40, %v261_v42 }
 0x238   :  { %v263_v46 = vadd.f32 %v350_v40, %v262_v44 }
 0x23a   :  { %v267_v48 = vsel %vm266_vm4, %v350_v40, %v263_v46 }
 0x23b   :  { %v272_v49 = vsel %vm269_vm5, %v271_v47, %v267_v48 }
 0x23c   :  { %v273_v50 = vmul.f32 %v348_v32, %v272_v49 }
 0x23e   :  { %274 = vst [vmem:[#allocation2] sm:$0xf] %v273_v50 }
 0x23f   :  { %286 = dma.vmem_to_hbm [thread:$0]  %s282_s8, 64, %s284_s22, [#allocation3]  }
 0x240   :  { %399 = dma.done.wait [#allocation3], 64  }
 0x241   :  { %400 = vsyncadd [#allocation3], 4294967232 }
 0x242   :  { %401 = dma.done.wait [#allocation5], 64  }
 0x243   :  { %402 = vsyncadd [#allocation5], 4294967232 }
 0x244   :  { %306 = vsyncpa [#allocation3], 1 }
 0x245   :  { %307 = vsyncpa [#allocation5], 1 }

</bundles_post_ra>
